<compile_context>
chip_gen: v7x
topology: tpu7x:2x2x1
jax: 0.10.0
libtpu: 0.0.40
codegen_flags: <defaults>
</compile_context>

<pallas_src>
import functools

import jax
import jax.numpy as jnp
from jax.experimental import pallas as pl
from jax.experimental.pallas import tpu as pltpu

HIDDEN = 16                 # nn.Linear(channel, 16) hidden width
_ASSUMED_TENSORCORES = 2    # v7x: 2 TCs/chip; extra grid steps are harmless on 1-TC parts


def se_kernel(x_ref, w1_ref, b1_ref, a_ref, w2_ref, b2_ref, o_ref, *, channels_last):
    # x_ref block:
    #   channels-first : (bb, C, HW)  -> spatial mean over lanes   (axis=-1)
    #   channels-last  : (bb, HW, C)  -> spatial mean over sublanes (axis=-2)
    spatial_axis = -2 if channels_last else -1

    # --- squeeze: global average pool, accumulated in f32 ---
    s = jnp.mean(x_ref[...].astype(jnp.float32), axis=spatial_axis)      # (bb, C)

    # --- excitation MLP (tiny; hidden under the DMA of the x/out tiles) ---
    h = jnp.dot(s, w1_ref[...], preferred_element_type=jnp.float32) + b1_ref[...]
    a = a_ref[0]                                    # PReLU slope (SMEM scalar)
    h = jnp.where(h >= 0, h, a * h)
    e = jnp.dot(h, w2_ref[...], preferred_element_type=jnp.float32) + b2_ref[...]
    e = jax.nn.sigmoid(e)                           # (bb, C), EUP path
    e = e.astype(o_ref.dtype)

    # --- scale: re-read x_ref so no big temp stays live across the reduce ---
    if channels_last:
        o_ref[...] = x_ref[...] * e[:, None, :]
    else:
        o_ref[...] = x_ref[...] * e[:, :, None]


def _pad_up(n, m):
    return -(-n // m) * m


def _pick_batch_block(B, per_batch_bytes, target_block_bytes):
    """Batch elements per grid step (partial tail block handled by cdiv grid)."""
    bb = max(1, min(B, target_block_bytes // max(1, per_batch_bytes)))
    # Keep enough grid steps for DMA/compute overlap AND megacore sharding on
    # v7x (>= 2 steps per TensorCore).
    min_steps = 2 * _ASSUMED_TENSORCORES
    if B >= min_steps:
        bb = min(bb, max(1, B // min_steps))
    elif B >= 2:
        bb = min(bb, B // 2)
    return bb


def _vmem_limit_bytes(block_bytes):
    try:
        phys = int(pltpu.get_tpu_info().vmem_capacity_bytes)
    except Exception:
        phys = 64 << 20                        # assume the smallest (v7x) part
    cap = min(64 << 20, (phys * 3) // 4)       # ~48 MiB on v7x, 64 MiB on v5e/v6e
    want = 4 * block_bytes + (2 << 20)         # double-buffered in+out + params/slack
    return int(min(cap, max(16 << 20, want)))


def se_layer(x, fc1_w, fc1_b, prelu_a, fc2_w, fc2_b, *, target_block_bytes=8 << 20):
    """Squeeze-and-Excitation forward pass.

    x: (B, C, H, W).  Weights in PyTorch nn.Linear layout:
      fc1_w: (16, C), fc1_b: (16,), fc2_w: (C, 16), fc2_b: (C,)
    prelu_a: shared scalar slope (nn.PReLU() default, init 0.25).
    """
    # TODO(synk): if the PReLU was built with num_parameters=C, pass a (1, C)
    #             VMEM vector instead of the SMEM scalar used here.
    B, C, H, W = x.shape
    HW = H * W
    itemsize = jnp.dtype(x.dtype).itemsize

    # Lane-density: make the *last* (lane) dim of the x/out block a multiple
    # of 128 whenever possible so stores are unmasked vst.
    channels_last = (HW % 128 != 0) and (C % 128 == 0)

    if channels_last:
        x_flat = x.reshape(B, C, HW).transpose(0, 2, 1)          # (B, HW, C)
        block_tail = (HW, C)
        sub_pad, lane_pad = _pad_up(HW, 8), _pad_up(C, 128)
    else:
        x_flat = x.reshape(B, C, HW)                             # (B, C, HW)
        block_tail = (C, HW)
        sub_pad, lane_pad = _pad_up(C, 8), _pad_up(HW, 128)

    per_batch_bytes = sub_pad * lane_pad * itemsize
    bb = _pick_batch_block(B, per_batch_bytes, target_block_bytes)
    grid = (pl.cdiv(B, bb),)      # partial tail block is safe: all ops are per-row
    # TODO(synk): for B == 1 with a feature map too large for one VMEM block,
    #             split into a squeeze+MLP kernel and a spatially-gridded
    #             scale kernel to restore pipelining and bound VMEM.

    block_bytes = bb * per_batch_bytes
    vmem_limit = _vmem_limit_bytes(block_bytes)

    # Kernel-side weight layout: s(bb,C) @ w1(C,16), then h(bb,16) @ w2(16,C).
    w1 = fc1_w.T.astype(jnp.float32)                  # (C, 16)
    b1 = fc1_b.reshape(1, HIDDEN).astype(jnp.float32)
    w2 = fc2_w.T.astype(jnp.float32)                  # (16, C)
    b2 = fc2_b.reshape(1, C).astype(jnp.float32)
    a = jnp.asarray(prelu_a, jnp.float32).reshape(1)

    x_spec = pl.BlockSpec((bb,) + block_tail, lambda g: (g, 0, 0))
    o_spec = pl.BlockSpec((bb,) + block_tail, lambda g: (g, 0, 0))

    out = pl.pallas_call(
        functools.partial(se_kernel, channels_last=channels_last),
        out_shape=jax.ShapeDtypeStruct(x_flat.shape, x.dtype),
        grid=grid,
        in_specs=[
            x_spec,                                               # x tile
            pl.BlockSpec((C, HIDDEN), lambda g: (0, 0)),          # w1
            pl.BlockSpec((1, HIDDEN), lambda g: (0, 0)),          # b1
            pl.BlockSpec((1,), lambda g: (0,),
                         memory_space=pltpu.MemorySpace.SMEM),    # PReLU slope
            pl.BlockSpec((HIDDEN, C), lambda g: (0, 0)),          # w2
            pl.BlockSpec((1, C), lambda g: (0, 0)),               # b2
        ],
        out_specs=o_spec,
        compiler_params=pltpu.CompilerParams(
            dimension_semantics=("parallel",),    # megacore sharding on v7x
            vmem_limit_bytes=vmem_limit,
        ),
    )(x_flat, w1, b1, a, w2, b2)

    if channels_last:
        out = out.transpose(0, 2, 1)
    return out.reshape(B, C, H, W)


def se_layer_ref(x, fc1_w, fc1_b, prelu_a, fc2_w, fc2_b):
    """Pure-JAX reference matching the PyTorch module semantics."""
    s = jnp.mean(x.astype(jnp.float32), axis=(2, 3))              # (B, C)
    h = s @ fc1_w.T + fc1_b
    h = jnp.where(h >= 0, h, prelu_a * h)                         # PReLU (shared scalar)
    e = jax.nn.sigmoid(h @ fc2_w.T + fc2_b)                       # (B, C)
    return x * e[:, :, None, None].astype(x.dtype)


if __name__ == "__main__":
    B, C, H, W = 2, 4, 16, 16

    key = jax.random.PRNGKey(0)
    kx, k1, kb1, k2, kb2 = jax.random.split(key, 5)

    x = jax.random.normal(kx, (B, C, H, W), dtype=jnp.float32)

    # Deterministic synthetic parameters in PyTorch nn.Linear layout.
    fc1_w = jax.random.normal(k1, (HIDDEN, C), dtype=jnp.float32) * 0.1   # (16, C)
    fc1_b = jax.random.normal(kb1, (HIDDEN,), dtype=jnp.float32) * 0.1    # (16,)
    prelu_a = 0.25                                    # nn.PReLU() default init
    fc2_w = jax.random.normal(k2, (C, HIDDEN), dtype=jnp.float32) * 0.1   # (C, 16)
    fc2_b = jax.random.normal(kb2, (C,), dtype=jnp.float32) * 0.1         # (C,)

    out = se_layer(x, fc1_w, fc1_b, prelu_a, fc2_w, fc2_b)
    jax.block_until_ready(out)

    ref = se_layer_ref(x, fc1_w, fc1_b, prelu_a, fc2_w, fc2_b)
    assert out.shape == (B, C, H, W)
    assert jnp.allclose(out, ref, atol=1e-5, rtol=1e-5), "mismatch vs reference"

    print("KERNEL_OK")
</pallas_src>

<mosaic_0001>
module attributes {stable_mosaic.version = 11 : i64} {
  func.func @se_kernel(%arg0: i32, %arg1: memref<1x4x256xf32, #tpu.memory_space<vmem>>, %arg2: memref<4x16xf32, #tpu.memory_space<vmem>>, %arg3: memref<1x16xf32, #tpu.memory_space<vmem>>, %arg4: memref<1xf32, #tpu.memory_space<smem>>, %arg5: memref<16x4xf32, #tpu.memory_space<vmem>>, %arg6: memref<1x4xf32, #tpu.memory_space<vmem>>, %arg7: memref<1x4x256xf32, #tpu.memory_space<vmem>>) attributes {dimension_semantics = [#tpu.dimension_semantics<parallel>], iteration_bounds = array<i64: 2>, scalar_prefetch = 0 : i64, scratch_operands = 0 : i64, tpu.core_type = #tpu.core_type<tc>, window_params = [{transform_indices = @transform_0, window_bounds = array<i64: 1, 4, 256>}, {pipeline_mode = #tpu.pipeline_mode<synchronous>, transform_indices = @transform_1, window_bounds = array<i64: 4, 16>}, {pipeline_mode = #tpu.pipeline_mode<synchronous>, transform_indices = @transform_2, window_bounds = array<i64: 1, 16>}, {transform_indices = @transform_3, window_bounds = array<i64: 1>}, {pipeline_mode = #tpu.pipeline_mode<synchronous>, transform_indices = @transform_4, window_bounds = array<i64: 16, 4>}, {pipeline_mode = #tpu.pipeline_mode<synchronous>, transform_indices = @transform_5, window_bounds = array<i64: 1, 4>}, {transform_indices = @transform_6, window_bounds = array<i64: 1, 4, 256>}]} {
    %c0 = arith.constant 0 : index
    %c0_0 = arith.constant 0 : index
    %c0_1 = arith.constant 0 : index
    %0 = vector.load %arg1[%c0, %c0_0, %c0_1] : memref<1x4x256xf32, #tpu.memory_space<vmem>>, vector<1x4x256xf32>
    %cst = arith.constant dense<0.000000e+00> : vector<1x4xf32>
    %1 = vector.multi_reduction <add>, %0, %cst [2] : vector<1x4x256xf32> to vector<1x4xf32>
    %cst_2 = arith.constant 2.560000e+02 : f32
    %2 = vector.broadcast %cst_2 : f32 to vector<1x4xf32>
    %3 = arith.divf %1, %2 : vector<1x4xf32>
    %c0_3 = arith.constant 0 : index
    %c0_4 = arith.constant 0 : index
    %4 = vector.load %arg2[%c0_3, %c0_4] : memref<4x16xf32, #tpu.memory_space<vmem>>, vector<4x16xf32>
    %cst_5 = arith.constant dense<0.000000e+00> : vector<1x16xf32>
    %5 = tpu.matmul %3, %4, %cst_5 {dimension_numbers = #tpu.dot_dimension_numbers<[1], [0], [0], [1], [0, 0, 1, 1], [], []>} : vector<1x4xf32>, vector<4x16xf32>, vector<1x16xf32> -> vector<1x16xf32>
    %c0_6 = arith.constant 0 : index
    %c0_7 = arith.constant 0 : index
    %6 = vector.load %arg3[%c0_6, %c0_7] : memref<1x16xf32, #tpu.memory_space<vmem>>, vector<1x16xf32>
    %7 = arith.addf %5, %6 : vector<1x16xf32>
    %c0_8 = arith.constant 0 : index
    %8 = memref.load %arg4[%c0_8] : memref<1xf32, #tpu.memory_space<smem>>
    %cst_9 = arith.constant 0.000000e+00 : f32
    %9 = vector.broadcast %cst_9 : f32 to vector<1x16xf32>
    %10 = arith.cmpf oge, %7, %9 : vector<1x16xf32>
    %11 = vector.broadcast %8 : f32 to vector<1x16xf32>
    %12 = arith.mulf %11, %7 : vector<1x16xf32>
    %13 = arith.select %10, %7, %12 : vector<1x16xi1>, vector<1x16xf32>
    %c0_10 = arith.constant 0 : index
    %c0_11 = arith.constant 0 : index
    %14 = vector.load %arg5[%c0_10, %c0_11] : memref<16x4xf32, #tpu.memory_space<vmem>>, vector<16x4xf32>
    %cst_12 = arith.constant dense<0.000000e+00> : vector<1x4xf32>
    %15 = tpu.matmul %13, %14, %cst_12 {dimension_numbers = #tpu.dot_dimension_numbers<[1], [0], [0], [1], [0, 0, 1, 1], [], []>} : vector<1x16xf32>, vector<16x4xf32>, vector<1x4xf32> -> vector<1x4xf32>
    %c0_13 = arith.constant 0 : index
    %c0_14 = arith.constant 0 : index
    %16 = vector.load %arg6[%c0_13, %c0_14] : memref<1x4xf32, #tpu.memory_space<vmem>>, vector<1x4xf32>
    %17 = arith.addf %15, %16 : vector<1x4xf32>
    %18 = arith.negf %17 : vector<1x4xf32>
    %19 = math.exp %18 : vector<1x4xf32>
    %cst_15 = arith.constant 1.000000e+00 : f32
    %20 = vector.broadcast %cst_15 : f32 to vector<1x4xf32>
    %21 = arith.addf %20, %19 : vector<1x4xf32>
    %22 = arith.divf %20, %21 : vector<1x4xf32>
    %c0_16 = arith.constant 0 : index
    %c0_17 = arith.constant 0 : index
    %c0_18 = arith.constant 0 : index
    %23 = vector.load %arg1[%c0_16, %c0_17, %c0_18] : memref<1x4x256xf32, #tpu.memory_space<vmem>>, vector<1x4x256xf32>
    %24 = vector.shape_cast %22 : vector<1x4xf32> to vector<1x4x1xf32>
    %25 = vector.broadcast %24 : vector<1x4x1xf32> to vector<1x4x256xf32>
    %26 = arith.mulf %23, %25 : vector<1x4x256xf32>
    %c0_19 = arith.constant 0 : index
    %c0_20 = arith.constant 0 : index
    %c0_21 = arith.constant 0 : index
    %27 = vector.load %arg7[%c0_19, %c0_20, %c0_21] : memref<1x4x256xf32, #tpu.memory_space<vmem>>, vector<1x4x256xf32>
    tpu.vector_store %arg7[%c0_19, %c0_20, %c0_21], %26 {strides = array<i32>} : memref<1x4x256xf32, #tpu.memory_space<vmem>>, vector<1x4x256xf32>,
    return
  }
  func.func @transform_0(%arg0: i32) -> (i32, i32, i32) {
    %c0_i32 = arith.constant 0 : i32
    %c0_i32_0 = arith.constant 0 : i32
    %c0_i32_1 = arith.constant 0 : i32
    return %arg0, %c0_i32, %c0_i32_0 : i32, i32, i32
  }
  func.func @transform_1(%arg0: i32) -> (i32, i32) {
    %c0_i32 = arith.constant 0 : i32
    %c0_i32_0 = arith.constant 0 : i32
    %c0_i32_1 = arith.constant 0 : i32
    return %c0_i32, %c0_i32_0 : i32, i32
  }
  func.func @transform_2(%arg0: i32) -> (i32, i32) {
    %c0_i32 = arith.constant 0 : i32
    %c0_i32_0 = arith.constant 0 : i32
    %c0_i32_1 = arith.constant 0 : i32
    return %c0_i32, %c0_i32_0 : i32, i32
  }
  func.func @transform_3(%arg0: i32) -> i32 {
    %c0_i32 = arith.constant 0 : i32
    %c0_i32_0 = arith.constant 0 : i32
    return %c0_i32 : i32
  }
  func.func @transform_4(%arg0: i32) -> (i32, i32) {
    %c0_i32 = arith.constant 0 : i32
    %c0_i32_0 = arith.constant 0 : i32
    %c0_i32_1 = arith.constant 0 : i32
    return %c0_i32, %c0_i32_0 : i32, i32
  }
  func.func @transform_5(%arg0: i32) -> (i32, i32) {
    %c0_i32 = arith.constant 0 : i32
    %c0_i32_0 = arith.constant 0 : i32
    %c0_i32_1 = arith.constant 0 : i32
    return %c0_i32, %c0_i32_0 : i32, i32
  }
  func.func @transform_6(%arg0: i32) -> (i32, i32, i32) {
    %c0_i32 = arith.constant 0 : i32
    %c0_i32_0 = arith.constant 0 : i32
    %c0_i32_1 = arith.constant 0 : i32
    return %arg0, %c0_i32, %c0_i32_0 : i32, i32, i32
  }
}

</mosaic_0001>

<bundles_post_ra>
// kernel: tpu_custom_call.1
= control target key start
LH: loop header
LB: loop body
LE: loop exit
PB: predicated region body
PF: predicated region fallthrough
CT: control target
= control target key end

     0   :  { %s842_s0 = inlined_call_operand.vmem [shape: f32[2,4,256], index: 0, kind: input, shape index: {}]   ;;  %s843_s1 = inlined_call_operand.vmem [shape: f32[4,16], index: 1, kind: input, shape index: {}]   ;;  %s844_s2 = inlined_call_operand.vmem [shape: f32[1,16], index: 2, kind: input, shape index: {}]   ;;  %s845_s3 = inlined_call_operand.<no memory space> [shape: f32[1], index: 3, kind: input, shape index: {}]   ;;  %s846_s4 = inlined_call_operand.vmem [shape: f32[16,4], index: 4, kind: input, shape index: {}]   ;;  %s847_s5 = inlined_call_operand.vmem [shape: f32[1,4], index: 5, kind: input, shape index: {}]   ;;  %s848_s6 = inlined_call_operand.hbm [shape: f32[2,4,256], index: 6, kind: output, shape index: {}]  }
   0x1   :  { %11 = sst [smem:[#allocation2]] %s845_s3 }
   0x2   :  { %12 = vsyncpa [#allocation4], 0 }
   0x3   :  { %14 = vsyncpa [#allocation4 + $0x1], 0  ;;  %s721_s23 = smov 0   ;;  %s723_s24 = smov 0  }
   0x4   :  { %s725_s25 = smov 0   ;;  %s727_s26 = smov 0  }
   0x5 LB: > { %s742_s3 = sadd.s32 4294967295, %s676_s26   ;;  %s528_s27 = sadd.s32 4294967294, %s676_s26   ;;  %s676_s26 = sphi %s727_s26, %s854_s26   ;;  %s672_s25 = sphi %s725_s25, %s853_s25   ;;  %s668_s24 = sphi %s723_s24, %s852_s24   ;;  %s664_s23 = sphi %s721_s23, %s851_s23  }
   0x6   : > { %s746_s28 = sadd.s32 1, %s676_s26   ;;  %s158_s29 = sadd.s32 1, %s672_s25 }
   0x7   : > { %s155_s30 = ssub.s32 %s676_s26, %s746_s28  ;;  %p168_p0 = scmp.ne.s32.totalorder %s672_s25, %s668_s24 }
   0x8   : > { %p156_p1 = scmp.eq.s32.totalorder %s155_s30, 0  ;;  %p169_p2 = scmp.eq.s32.totalorder %s742_s3, 1 }
   0x9   : > { %p174_p3 = scmp.ne.s32.totalorder %s668_s24, %s664_s23  ;;  %p175_p4 = scmp.eq.s32.totalorder %s528_s27, 1 }
   0xa   : > { %s757_s7 = scalar_select %p156_p1, %s672_s25, %s158_s29  }
   0xb   : > { %p759_p5 = por %p169_p2, %p168_p0  ;;  %p763_p6 = por %p175_p4, %p174_p3 }
   0xc   : > { %p531_p7 = scmp.ge.s32.totalorder %s676_s26, 1  ;;  %p216_p8 = scmp.lt.s32.totalorder %s676_s26, 3 }
   0xe   : > { %p217_p9 = pnand %p531_p7, %p216_p8 }
   0xf   : > { %p246_p10 = scmp.lt.s32.totalorder (!%p217_p9), %s742_s3, 1  ;;  %vm255_vm0 = vcmask (!%p217_p9), 1043456   ;;  %v678_v5 = vmov (!%p217_p9), 0.0   ;;  %v263_v6 = vld [vmem:[%s843_s1] sm:$0xf] (!%p217_p9)  ;;  %vm679_vm1 = vmmov (!%p217_p9), 0   ;;  %v266_v7 = vlaneseq (!%p217_p9) }
  0x10   : > { %220 = sbr.rel (%p217_p9) target bundleno = 771 (0x303), region = 44  ;;  %551 = vmatprep.subr.mxu0 (!%p217_p9), %v678_v5  ;;  %553 = vmatprep.mubr.msk.f32.mxu0 (!%p217_p9), %vm679_vm1, %v678_v5  ;;  %vm272_vm2 = vcmask (!%p217_p9), 31744   ;;  %v353_v14 = vld [vmem:[%s846_s4] sm:$0xff] (!%p217_p9)  ;;  %v354_v15 = vld [vmem:[%s846_s4 + $0x8] sm:$0xff] (!%p217_p9)  ;;  %v680_v17 = vmov (!%p217_p9), 0.0|0.0   ;;  %s348_s21 = sld [smem:[#allocation2]] (!%p217_p9) }
  0x11   : > { %552 = vmatpush3.msk.msra.mxu0 (!%p217_p9), %vm255_vm0, %v263_v6  ;;  %560 = vmatprep.mubr.msk.f32.mxu1 (!%p217_p9), %vm679_vm1, %v678_v5  ;;  %v267_v8 = vand.u32 (!%p217_p9), 127, %v266_v7  ;;  %v269_v9 = vshrl.u32 (!%p217_p9), %v266_v7, 7  ;;  %v564_v16 = vpack.c.bf16 (!%p217_p9), %v354_v15, %v353_v14  ;;  %v264_v18 = vld [vmem:[%s844_s2] sm:$0x1] (!%p217_p9)  ;;  %vm356_vm4 = vcmask (!%p217_p9), 130048   ;;  %s545_s12 = sshll.u32 (!%p217_p9), %s742_s3, 7 }
  0x12   : > { %563 = vmatprep.subr.bf16.mxu1 (!%p217_p9), %v680_v17  ;;  %v355_v25 = vld [vmem:[%s847_s5] sm:$0x1] (!%p217_p9)  ;;  %v681_v35 = vmov (!%p217_p9), 839922192   ;;  %s800_s17 = scalar_lea.hbm (!%p217_p9), %s848_s6, %s545_s12 }
  0x13   : > { %v270_v10 = vsub.s32 (!%p217_p9), %v267_v8, %v269_v9  ;;  %565 = vmatpush3.bf16.msra.mxu1 (!%p217_p9), %v564_v16  ;;  %v438_v32 = vsub.s32 (!%p217_p9), 0, %v269_v9  ;;  %v445_v36 = vunpack.c.l.s4 (!%p217_p9), %v681_v35 }
  0x15   : > { %v446_v37 = vunpack.c.0.s8 (!%p217_p9), %v445_v36 }
  0x16   : > { %v350_v20 = vstv (!%p217_p9), %s348_s21 }
  0x17   : > { %s247_s10 = scalar_select %p246_p10, %s742_s3, 1  ;;  %v449_v38 = vsub.s32 %v446_v37, %v269_v9 }
  0x18   : > { %s682_s3 = smov [#allocation3]  }
  0x19   : > { %s544_s11 = sshll.u32 %s247_s10, 3  ;;  %s243_s10 = sand.u32 1, %s668_s24  }
  0x1a   : > { %s250_s14 = scalar_lea.vmem %s842_s0, %s544_s11  ;;  %s532_s11 = sshll.u32 %s243_s10, 3 }
  0x1b   : > { %v774_v0 = vld [vmem:[%s250_s14] sm:$0xff]  ;;  %s245_s13 = scalar_lea.vmem [#allocation3], %s532_s11  ;;  %s455_s18 = scalar_lea.sflag [#allocation4], %s243_s10 }
  0x1c   : > { %v253_v1 = vcombine.high %v774_v0, %v774_v0  ;;  %v256_v2 = vsel %vm255_vm0, %v774_v0, 0.0  ;;  %s469_s14 = sshll.u32 %s245_s13, 4  ;;  %s618_s20 = sshll.u32 %s682_s3, 4  ;;  %s802_s14 = int_to_ptr.vmem [resolvable:$true] %s469_s14  ;;  %s619_s20 = int_to_ptr.vmem [resolvable:$false] %s618_s20 }
  0x1d   : > { %s614_s19 = scalar_lea.vmem %s802_s14, 128  ;;  %s620_s21 = scalar_lea.vmem %s619_s20, 256 }
  0x1e   : > { %v257_v3 = vsel %vm255_vm0, %v253_v1, 0.0  ;;  %p615_p11 = scmp.ne.s32.totalorder %s802_s14, %s614_s19  ;;  %p621_p0 = scmp.lt.s32.totalorder %s802_s14, %s619_s20 }
  0x1f   : > { %v258_v4 = vadd.f32 %v257_v3, %v256_v2  ;;  %p622_p1 = scmp.lt.s32.totalorder %s620_s21, %s614_s19 }
  0x20   : > { %p616_p12 = pnand %p615_p11, %p759_p5 }
  0x21   : > { %259 = vadd.xlane.f32.xlu0 %v258_v4  ;;  %p623_p2 = por %p622_p1, %p621_p0 }
  0x22   : > { %p617_p13 = pneg %p616_p12 }
  0x24   : > { %p624_p3 = pnand %p623_p2, %p617_p13 }
  0xae   : > { %v260_v11 = vpop.xlane.xlu0 %259 }
  0xaf   : > { %v262_v12 = vmul.f32 0.00390625, %v260_v11 }
  0xb1   : > { %v271_v13 = vrot.slane %v262_v12, %v270_v10 }
  0xb3   : > { %554 = vmatmul.mubr.msk.f32.vlgmr.msra.gmra.mrb[0].mxu0 %vm272_vm2, %v271_v13 }
 0x186   : > { %v344_v19 = vpop.f32.mrb[0].mxu0 }
 0x187   : > { %v345_v21 = vadd.f32 %v344_v19, %v264_v18  ;;  %v555_v22 = vpop.f32.mrb[1].mxu0 }
 0x189   : > { %vm349_vm3 = vcmp.ge.f32.partialorder %v345_v21, 0.0  ;;  %v351_v23 = vmul.f32 %v350_v20, %v345_v21 }
 0x18b   : > { %v352_v24 = vsel %vm349_vm3, %v345_v21, %v351_v23 }
 0x18c   : > { %561 = vmatmul.mubr.msk.f32.vlgmr.msra.gmra.mrb[0].mxu1 %vm356_vm4, %v352_v24 }
 0x25f   : > { %v426_v26 = vpop.f32.mrb[0].mxu1 }
 0x260   : > { %v427_v27 = vadd.f32 %v426_v26, %v355_v25  ;;  %v562_v28 = vpop.f32.mrb[1].mxu1 }
 0x262   : > { %v538_v29 = vmul.f32 -1.442695, %v427_v27 }
 0x264   : > { %610 = vpow2.f32 %v538_v29 }
 0x26e   : > { %v611_v30 = vpop.eup %610 }
 0x26f   : > { %v433_v31 = vadd.f32 1.0, %v611_v30 }
 0x271   : > { %612 = vrcp.f32 %v433_v31 }
 0x27b   : > { %v613_v33 = vpop.eup %612 }
 0x27c   : > { %v439_v34 = vrot.slane %v613_v33, %v438_v32 }
 0x27e   : > { %441 = vbcast.lane.b32.xlu0 %v439_v34, 256 }
 0x2f0   : > { %v442_v39 = vpop.permute.xlu0 %441 }
 0x2f1   : > { %v450_v40 = vrot.slane %v442_v39, %v449_v38 }
 0x2f3   : > { %v452_v41 = vmul.f32 %v450_v40, %v774_v0 }
 0x2f5   : > { %453 = vst [vmem:[%s245_s13] sm:$0xff] %v452_v41 }
 0x2f6   : > { %627 = shalt.err (!%p624_p3)
}
 0x2f7   : > { %s628_s22 = scalar_lea.hbm %s800_s17, 128  ;;  %s632_s30 = scalar_lea.hbm %s848_s6, 256 }
 0x2f8   : > { %p629_p4 = scmp.ne.s32.totalorder %s800_s17, %s628_s22  ;;  %p633_p9 = scmp.lt.u32.totalorder %s800_s17, %s848_s6 }
 0x2f9   : > { %p634_p10 = scmp.lt.u32.totalorder %s632_s30, %s628_s22  ;;  %p636_p12 = scmp.lt.u32.totalorder %s628_s22, %s800_s17 }
 0x2fa   : > { %p630_p7 = pnand %p629_p4, %p759_p5 }
 0x2fb   : > { %p635_p11 = por %p634_p10, %p633_p9 }
 0x2fc   : > { %p631_p8 = pneg %p630_p7 }
 0x2fd   : > { %p637_p13 = por %p636_p12, %p635_p11 }
 0x2ff   : > { %p638_p0 = pnand %p637_p13, %p631_p8 }
 0x301   : > { %641 = shalt.err (!%p638_p0)
}
 0x302   : > { %566 = dma.vmem_to_hbm [thread:$0]  (%p759_p5), %s802_s14, 128, %s800_s17, %s455_s18  }
 0x303 PF: > { %p572_p1 = scmp.ge.s32.totalorder %s676_s26, 2  ;;  %s481_s12 = sand.u32 1, %s664_s23  }
 0x304   : > { %s482_s13 = scalar_lea.sflag [#allocation4], %s481_s12 }
 0x305   : > { %p569_p2 = pnand %p572_p1, %p763_p6 }
 0x307   : > { %659 = dma.done.wait (!%p569_p2), %s482_s13, 128  }
 0x308   : > { %661 = vsyncadd (!%p569_p2), %s482_s13, 4294967168  ;;  %p17_p3 = scmp.ge.s32.totalorder %s746_s28, 4   ;;  %s851_s23 = smov %s668_s24 }
 0x309   : > { %s852_s24 = smov %s672_s25  ;;  %s853_s25 = smov %s757_s7 }
 0x30a   : > { %s854_s26 = smov %s746_s28  ;;  %19 = sbr.rel (!%p17_p3) target bundleno = 5 (0x5), region = 79 }
 0x311   :  { %487 = vsyncpa [#allocation4], 1 }
 0x312   :  { %489 = vsyncpa [#allocation4 + $0x1], 1 }

</bundles_post_ra>
